<compile_context>
chip_gen: v7x
topology: tpu7x:2x2x1
jax: 0.10.0
libtpu: 0.0.40
codegen_flags: <defaults>
</compile_context>

<pallas_src>
import functools

import jax
import jax.numpy as jnp
from jax.experimental import pallas as pl
from jax.experimental.pallas import tpu as pltpu

LANE = 128      # vreg lane width (last-dim grain)
SUBLANE = 8     # f32 sublane grain (second-to-last-dim grain)


def _round_up(x, m):
    return ((x + m - 1) // m) * m


def _vmem_capacity():
    """Physical per-core VMEM bytes (generation aware), conservative fallback."""
    try:
        return int(pltpu.get_tpu_info().vmem_capacity_bytes)
    except Exception:
        return 64 << 20   # assume v7x (smallest VMEM) if the query is unavailable


def _orthogonal(key, out_features, in_features, dtype=jnp.float32):
    """Deterministic equivalent of torch.nn.init.orthogonal_ for an (out, in) weight."""
    rows, cols = out_features, in_features
    transpose = rows < cols
    shape = (cols, rows) if transpose else (rows, cols)
    a = jax.random.normal(key, shape, dtype=jnp.float32)
    q, r = jnp.linalg.qr(a)
    d = jnp.diagonal(r)
    signs = jnp.where(d == 0, 1.0, jnp.sign(d))   # never zero a column
    q = q * signs[None, :]
    w = q.T if transpose else q
    return w.astype(dtype)  # (out_features, in_features)


def init_critic_params(key, layer_num, state_dim, action_dim, hidden_units):
    """Logical (unpadded) params: W in (in, out) layout, b in (1, out), f32."""
    # NOTE: torch Critic with action_shape=0 would build Linear(hidden, 0);
    # we require action_dim >= 1 for a meaningful kernel.
    dims = [state_dim] + [hidden_units] * layer_num + [max(action_dim, 1)]
    params = []
    keys = jax.random.split(key, len(dims) - 1)
    for i in range(len(dims) - 1):
        d_in, d_out = dims[i], dims[i + 1]
        w_torch = _orthogonal(keys[i], d_out, d_in)   # (out, in), PyTorch layout
        w = jnp.transpose(w_torch)                    # (in, out) for the kernel
        b = jnp.zeros((1, d_out), dtype=jnp.float32)
        params.append((w, b))
    return params


def pack_critic_params(params):
    """Zero-pad feature dims to the 128-lane grain.

    Returns (weights, b_all, layer_dims_p):
      weights      : tuple of bf16 (d_in_p, d_out_p) matrices
      b_all        : single f32 (num_linear, d_out_max_p) stacked bias array
      layer_dims_p : tuple of padded (d_in_p, d_out_p) per layer
    """
    weights = []
    bias_rows = []
    layer_dims_p = []
    for w, b in params:
        d_in, d_out = w.shape
        d_in_p, d_out_p = _round_up(d_in, LANE), _round_up(d_out, LANE)
        w_p = jnp.zeros((d_in_p, d_out_p), jnp.bfloat16)
        w_p = w_p.at[:d_in, :d_out].set(w.astype(jnp.bfloat16))
        weights.append(w_p)
        bias_rows.append((jnp.reshape(b, (-1,)).astype(jnp.float32), d_out))
        layer_dims_p.append((d_in_p, d_out_p))
    d_max_p = max(dp for _, dp in layer_dims_p)
    b_all = jnp.zeros((len(params), d_max_p), jnp.float32)
    for i, (bv, d_out) in enumerate(bias_rows):
        b_all = b_all.at[i, :d_out].set(bv)
    return tuple(weights), b_all, tuple(layer_dims_p)


def _make_critic_kernel(layer_dims_p, transpose_out, d_out_t):
    """Kernel over one batch tile: len(layer_dims_p) Linears, ReLU between all but last."""
    num_linear = len(layer_dims_p)

    def kernel(*refs):
        x_ref = refs[0]
        w_refs = refs[1:1 + num_linear]
        b_ref = refs[1 + num_linear]
        out_ref = refs[2 + num_linear]

        h = x_ref[...]                                   # (TB, d_in_p) bf16
        for i in range(num_linear):
            d_out_p = layer_dims_p[i][1]
            w = w_refs[i][...]                           # (d_in_p, d_out_p) bf16, resident
            b = b_ref[i:i + 1, :d_out_p]                 # (1, d_out_p) f32, resident
            hb = h if h.dtype == jnp.bfloat16 else h.astype(jnp.bfloat16)
            # bf16 x bf16 on the MXU, f32 accumulation; bias add / ReLU in f32.
            h = jnp.dot(hb, w, preferred_element_type=jnp.float32) + b
            if i < num_linear - 1:
                h = jnp.maximum(h, 0.0)
            # TODO(synk): on v6e/v7x (bf16 VPU) the bias-add/ReLU chain could run in
            # bf16 to halve vreg pressure; kept f32 for v5e compatibility.
        if transpose_out:
            # Pack the narrow value head into a sublane-dense (d_out_t, TB) slab
            # (XLU transpose) instead of a (TB, 128) block where most lanes are
            # padding -> up to 16x less output writeback.
            out_ref[...] = h.T[:d_out_t, :].astype(out_ref.dtype)
        else:
            out_ref[...] = h.astype(out_ref.dtype)       # lane-dense (TB, d_out_p)

    return kernel


@functools.partial(
    jax.jit,
    static_argnames=("layer_dims_p", "block_batch", "transpose_out", "d_out_t",
                     "single_buffer_params", "vmem_cap_bytes"))
def _critic_pallas(x_p, weights, b_all, *, layer_dims_p, block_batch,
                   transpose_out, d_out_t, single_buffer_params, vmem_cap_bytes):
    batch_p, d_in_p = x_p.shape
    num_linear = len(layer_dims_p)
    d_out_p = layer_dims_p[-1][1]
    n_blocks = batch_p // block_batch

    kernel = _make_critic_kernel(layer_dims_p, transpose_out, d_out_t)

    def _resident_spec(shape):
        # Constant index_map -> block resident across the whole grid; a single
        # buffer is enough (double buffering would just waste VMEM).
        if single_buffer_params:
            return pl.BlockSpec(shape, lambda i: (0, 0),
                                pipeline_mode=pl.Buffered(1))
        return pl.BlockSpec(shape, lambda i: (0, 0))

    # Activations tiled over the batch (double-buffered, pipelined DMA);
    # weights + stacked biases resident.
    in_specs = [pl.BlockSpec((block_batch, d_in_p), lambda i: (i, 0))]
    for w in weights:
        in_specs.append(_resident_spec(w.shape))
    in_specs.append(_resident_spec(b_all.shape))

    if transpose_out:
        out_shape = jax.ShapeDtypeStruct((d_out_t, batch_p), jnp.float32)
        out_specs = pl.BlockSpec((d_out_t, block_batch), lambda i: (0, i))
        out_block_bytes = d_out_t * block_batch * 4
        out_bytes = d_out_t * batch_p * 4
    else:
        out_shape = jax.ShapeDtypeStruct((batch_p, d_out_p), jnp.float32)
        out_specs = pl.BlockSpec((block_batch, d_out_p), lambda i: (i, 0))
        out_block_bytes = block_batch * d_out_p * 4
        out_bytes = batch_p * d_out_p * 4

    # Cost estimate + VMEM budget (all static Python ints at trace time).
    param_bytes = sum(int(w.size) * w.dtype.itemsize for w in weights)
    param_bytes += int(b_all.size) * b_all.dtype.itemsize
    flops = sum(2 * batch_p * di * do for di, do in layer_dims_p)
    bytes_accessed = int(x_p.size) * x_p.dtype.itemsize + out_bytes + param_bytes

    x_block_bytes = block_batch * d_in_p * x_p.dtype.itemsize
    act_bytes = sum(block_batch * do * 4 for _, do in layer_dims_p)
    param_buf = 1 if single_buffer_params else 2
    vmem_needed = (2 * (x_block_bytes + out_block_bytes)
                   + param_buf * param_bytes + act_bytes + (4 << 20))
    vmem_limit = int(min(max(vmem_needed, 32 << 20), vmem_cap_bytes))
    # TODO(synk): when param_bytes exceeds the VMEM budget (hidden >~ 2K on v7x),
    # stream weights per layer from HBM (pl.ANY refs + pltpu.emit_pipeline)
    # instead of keeping every layer resident.

    return pl.pallas_call(
        kernel,
        out_shape=out_shape,
        grid_spec=pltpu.PrefetchScalarGridSpec(
            num_scalar_prefetch=0,
            grid=(n_blocks,),
            in_specs=in_specs,
            out_specs=out_specs,
        ),
        compiler_params=pltpu.CompilerParams(
            dimension_semantics=("parallel",),     # shard batch tiles over v7x TCs
            vmem_limit_bytes=vmem_limit,
        ),
        cost_estimate=pl.CostEstimate(
            flops=flops, transcendentals=0, bytes_accessed=bytes_accessed),
    )(x_p, *weights, b_all)


def _pick_batch_tile(batch):
    """Largest tile in {512..8} with <=~25% padding waste; split 1-step grids."""
    bp8 = _round_up(batch, SUBLANE)
    tb = SUBLANE
    for cand in (512, 256, 128, 64, 32, 16, 8):
        if _round_up(batch, cand) <= bp8 + bp8 // 4:
            tb = cand
            break
    # v7x megacore: a 1-step grid leaves the second TensorCore idle; make >=2 tiles.
    if _round_up(batch, tb) // tb == 1 and tb >= 2 * SUBLANE:
        tb //= 2
    return tb


def critic_forward(s, packed_params, out_dim):
    """Critic.forward: flatten state, run MLP, return (batch, out_dim) f32 values."""
    weights, b_all, layer_dims_p = packed_params
    batch = s.shape[0]
    x = jnp.reshape(s, (batch, -1))
    d_in = x.shape[1]
    d_in_p = layer_dims_p[0][0]
    d_out_p = layer_dims_p[-1][1]

    tb = _pick_batch_tile(batch)
    batch_p = _round_up(batch, tb)
    n_blocks = batch_p // tb

    # bf16 activations: the first matmul consumes bf16 anyway; halves input DMA.
    x_p = jnp.zeros((batch_p, d_in_p), jnp.bfloat16)
    x_p = x_p.at[:batch, :d_in].set(x.astype(jnp.bfloat16))

    d_out_t = _round_up(max(out_dim, 1), SUBLANE)
    # Transposed (sublane-packed) output only when the block stays lane-dense
    # (TB multiple of 128) or covers the full array.
    transpose_out = (d_out_t < d_out_p) and (tb % LANE == 0 or n_blocks == 1)

    vmem_cap = _vmem_capacity() - (16 << 20)   # leave compiler headroom

    kwargs = dict(layer_dims_p=layer_dims_p, block_batch=tb,
                  transpose_out=transpose_out, d_out_t=d_out_t,
                  vmem_cap_bytes=vmem_cap)
    try:
        out_p = _critic_pallas(x_p, weights, b_all,
                               single_buffer_params=True, **kwargs)
    except Exception:
        # pl.Buffered(1) not accepted by this build -> default double buffering.
        out_p = _critic_pallas(x_p, weights, b_all,
                               single_buffer_params=False, **kwargs)

    if transpose_out:
        return out_p[:out_dim, :batch].T
    return out_p[:batch, :out_dim]


def _critic_ref(s, params):
    """Pure-JAX f32 reference on the unpadded parameters."""
    batch = s.shape[0]
    h = jnp.reshape(s, (batch, -1)).astype(jnp.float32)
    for i, (w, b) in enumerate(params):
        h = h @ w + b
        if i < len(params) - 1:
            h = jnp.maximum(h, 0.0)
    return h


if __name__ == "__main__":
    # Small shapes consistent with the module defaults:
    #   layer_num=2, state_shape=(4, 4) -> state_dim=16, hidden_units=128,
    #   action_dim=1 (value head), batch=2.
    layer_num = 2
    state_shape = (4, 4)
    hidden_units = 128
    action_dim = 1
    batch = 2

    key = jax.random.PRNGKey(0)
    k_param, k_input = jax.random.split(key)

    state_dim = 1
    for d in state_shape:
        state_dim *= d

    params = init_critic_params(k_param, layer_num, state_dim, action_dim, hidden_units)
    packed = pack_critic_params(params)
    s = jax.random.normal(k_input, (batch,) + state_shape, dtype=jnp.float32)

    out = critic_forward(s, packed, out_dim=action_dim)
    out = jax.block_until_ready(out)

    ref = _critic_ref(s, params)
    assert out.shape == (batch, action_dim), out.shape
    # bf16 weights/activations (f32 accumulation) -> loosened tolerance vs. f32 ref.
    assert jnp.allclose(out, ref, atol=3e-2, rtol=3e-2), (out, ref)

    print("KERNEL_OK")
</pallas_src>

<mosaic_0001>
module attributes {stable_mosaic.version = 11 : i64} {
  func.func @kernel(%arg0: i32, %arg1: memref<8x128xbf16, #tpu.memory_space<vmem>>, %arg2: memref<128x128xbf16, #tpu.memory_space<vmem>>, %arg3: memref<128x128xbf16, #tpu.memory_space<vmem>>, %arg4: memref<128x128xbf16, #tpu.memory_space<vmem>>, %arg5: memref<3x128xf32, #tpu.memory_space<vmem>>, %arg6: memref<8x8xf32, #tpu.memory_space<vmem>>) attributes {dimension_semantics = [#tpu.dimension_semantics<parallel>], iteration_bounds = array<i64: 1>, scalar_prefetch = 0 : i64, scratch_operands = 0 : i64, tpu.core_type = #tpu.core_type<tc>, window_params = [{transform_indices = @transform_0, window_bounds = array<i64: 8, 128>}, {pipeline_mode = #tpu.pipeline_mode<synchronous>, transform_indices = @transform_1, window_bounds = array<i64: 128, 128>}, {pipeline_mode = #tpu.pipeline_mode<synchronous>, transform_indices = @transform_2, window_bounds = array<i64: 128, 128>}, {pipeline_mode = #tpu.pipeline_mode<synchronous>, transform_indices = @transform_3, window_bounds = array<i64: 128, 128>}, {pipeline_mode = #tpu.pipeline_mode<synchronous>, transform_indices = @transform_4, window_bounds = array<i64: 3, 128>}, {transform_indices = @transform_5, window_bounds = array<i64: 8, 8>}]} {
    %c0 = arith.constant 0 : index
    %c0_0 = arith.constant 0 : index
    %0 = vector.load %arg1[%c0, %c0_0] : memref<8x128xbf16, #tpu.memory_space<vmem>>, vector<8x128xbf16>
    %c0_1 = arith.constant 0 : index
    %c0_2 = arith.constant 0 : index
    %1 = vector.load %arg2[%c0_1, %c0_2] : memref<128x128xbf16, #tpu.memory_space<vmem>>, vector<128x128xbf16>
    %c0_3 = arith.constant 0 : index
    %c0_4 = arith.constant 0 : index
    %2 = vector.load %arg5[%c0_3, %c0_4] : memref<3x128xf32, #tpu.memory_space<vmem>>, vector<1x128xf32>
    %cst = arith.constant dense<0.000000e+00> : vector<8x128xf32>
    %3 = tpu.matmul %0, %1, %cst {dimension_numbers = #tpu.dot_dimension_numbers<[1], [0], [0], [1], [0, 0, 1, 1], [], []>} : vector<8x128xbf16>, vector<128x128xbf16>, vector<8x128xf32> -> vector<8x128xf32>
    %4 = vector.broadcast %2 : vector<1x128xf32> to vector<8x128xf32>
    %5 = arith.addf %3, %4 : vector<8x128xf32>
    %cst_5 = arith.constant 0.000000e+00 : f32
    %6 = vector.broadcast %cst_5 : f32 to vector<8x128xf32>
    %7 = arith.maximumf %5, %6 : vector<8x128xf32>
    %c0_6 = arith.constant 0 : index
    %c0_7 = arith.constant 0 : index
    %8 = vector.load %arg3[%c0_6, %c0_7] : memref<128x128xbf16, #tpu.memory_space<vmem>>, vector<128x128xbf16>
    %c1 = arith.constant 1 : index
    %c0_8 = arith.constant 0 : index
    %9 = vector.load %arg5[%c1, %c0_8] : memref<3x128xf32, #tpu.memory_space<vmem>>, vector<1x128xf32>
    %10 = arith.truncf %7 : vector<8x128xf32> to vector<8x128xbf16>
    %cst_9 = arith.constant dense<0.000000e+00> : vector<8x128xf32>
    %11 = tpu.matmul %10, %8, %cst_9 {dimension_numbers = #tpu.dot_dimension_numbers<[1], [0], [0], [1], [0, 0, 1, 1], [], []>} : vector<8x128xbf16>, vector<128x128xbf16>, vector<8x128xf32> -> vector<8x128xf32>
    %12 = vector.broadcast %9 : vector<1x128xf32> to vector<8x128xf32>
    %13 = arith.addf %11, %12 : vector<8x128xf32>
    %cst_10 = arith.constant 0.000000e+00 : f32
    %14 = vector.broadcast %cst_10 : f32 to vector<8x128xf32>
    %15 = arith.maximumf %13, %14 : vector<8x128xf32>
    %c0_11 = arith.constant 0 : index
    %c0_12 = arith.constant 0 : index
    %16 = vector.load %arg4[%c0_11, %c0_12] : memref<128x128xbf16, #tpu.memory_space<vmem>>, vector<128x128xbf16>
    %c2 = arith.constant 2 : index
    %c0_13 = arith.constant 0 : index
    %17 = vector.load %arg5[%c2, %c0_13] : memref<3x128xf32, #tpu.memory_space<vmem>>, vector<1x128xf32>
    %18 = arith.truncf %15 : vector<8x128xf32> to vector<8x128xbf16>
    %cst_14 = arith.constant dense<0.000000e+00> : vector<8x128xf32>
    %19 = tpu.matmul %18, %16, %cst_14 {dimension_numbers = #tpu.dot_dimension_numbers<[1], [0], [0], [1], [0, 0, 1, 1], [], []>} : vector<8x128xbf16>, vector<128x128xbf16>, vector<8x128xf32> -> vector<8x128xf32>
    %20 = vector.broadcast %17 : vector<1x128xf32> to vector<8x128xf32>
    %21 = arith.addf %19, %20 : vector<8x128xf32>
    %22 = tpu.transpose %21, [1, 0] : vector<8x128xf32> -> vector<128x8xf32>
    %23 = vector.extract_strided_slice %22 {offsets = [0, 0], sizes = [8, 8], strides = [1, 1]} : vector<128x8xf32> to vector<8x8xf32>
    %c0_15 = arith.constant 0 : index
    %c0_16 = arith.constant 0 : index
    %24 = vector.load %arg6[%c0_15, %c0_16] : memref<8x8xf32, #tpu.memory_space<vmem>>, vector<8x8xf32>
    tpu.vector_store %arg6[%c0_15, %c0_16], %23 {strides = array<i32>} : memref<8x8xf32, #tpu.memory_space<vmem>>, vector<8x8xf32>,
    return
  }
  func.func @transform_0(%arg0: i32) -> (i32, i32) {
    %c0_i32 = arith.constant 0 : i32
    %c0_i32_0 = arith.constant 0 : i32
    return %arg0, %c0_i32 : i32, i32
  }
  func.func @transform_1(%arg0: i32) -> (i32, i32) {
    %c0_i32 = arith.constant 0 : i32
    %c0_i32_0 = arith.constant 0 : i32
    %c0_i32_1 = arith.constant 0 : i32
    return %c0_i32, %c0_i32_0 : i32, i32
  }
  func.func @transform_2(%arg0: i32) -> (i32, i32) {
    %c0_i32 = arith.constant 0 : i32
    %c0_i32_0 = arith.constant 0 : i32
    %c0_i32_1 = arith.constant 0 : i32
    return %c0_i32, %c0_i32_0 : i32, i32
  }
  func.func @transform_3(%arg0: i32) -> (i32, i32) {
    %c0_i32 = arith.constant 0 : i32
    %c0_i32_0 = arith.constant 0 : i32
    %c0_i32_1 = arith.constant 0 : i32
    return %c0_i32, %c0_i32_0 : i32, i32
  }
  func.func @transform_4(%arg0: i32) -> (i32, i32) {
    %c0_i32 = arith.constant 0 : i32
    %c0_i32_0 = arith.constant 0 : i32
    %c0_i32_1 = arith.constant 0 : i32
    return %c0_i32, %c0_i32_0 : i32, i32
  }
  func.func @transform_5(%arg0: i32) -> (i32, i32) {
    %c0_i32 = arith.constant 0 : i32
    %c0_i32_0 = arith.constant 0 : i32
    return %c0_i32, %arg0 : i32, i32
  }
}

module attributes {stable_mosaic.version = 11 : i64} {
  func.func @kernel(%arg0: i32, %arg1: memref<8x128xbf16, #tpu.memory_space<vmem>>, %arg2: memref<128x128xbf16, #tpu.memory_space<vmem>>, %arg3: memref<128x128xbf16, #tpu.memory_space<vmem>>, %arg4: memref<128x128xbf16, #tpu.memory_space<vmem>>, %arg5: memref<3x128xf32, #tpu.memory_space<vmem>>, %arg6: memref<8x8xf32, #tpu.memory_space<vmem>>) attributes {dimension_semantics = [#tpu.dimension_semantics<parallel>], iteration_bounds = array<i64: 1>, scalar_prefetch = 0 : i64, scratch_operands = 0 : i64, tpu.core_type = #tpu.core_type<tc>, window_params = [{transform_indices = @transform_0, window_bounds = array<i64: 8, 128>}, {pipeline_mode = #tpu.pipeline_mode<synchronous>, transform_indices = @transform_1, window_bounds = array<i64: 128, 128>}, {pipeline_mode = #tpu.pipeline_mode<synchronous>, transform_indices = @transform_2, window_bounds = array<i64: 128, 128>}, {pipeline_mode = #tpu.pipeline_mode<synchronous>, transform_indices = @transform_3, window_bounds = array<i64: 128, 128>}, {pipeline_mode = #tpu.pipeline_mode<synchronous>, transform_indices = @transform_4, window_bounds = array<i64: 3, 128>}, {transform_indices = @transform_5, window_bounds = array<i64: 8, 8>}]} {
    %c0 = arith.constant 0 : index
    %c0_0 = arith.constant 0 : index
    %0 = vector.load %arg1[%c0, %c0_0] : memref<8x128xbf16, #tpu.memory_space<vmem>>, vector<8x128xbf16>
    %c0_1 = arith.constant 0 : index
    %c0_2 = arith.constant 0 : index
    %1 = vector.load %arg2[%c0_1, %c0_2] : memref<128x128xbf16, #tpu.memory_space<vmem>>, vector<128x128xbf16>
    %c0_3 = arith.constant 0 : index
    %c0_4 = arith.constant 0 : index
    %2 = vector.load %arg5[%c0_3, %c0_4] : memref<3x128xf32, #tpu.memory_space<vmem>>, vector<1x128xf32>
    %cst = arith.constant dense<0.000000e+00> : vector<8x128xf32>
    %3 = tpu.matmul %0, %1, %cst {dimension_numbers = #tpu.dot_dimension_numbers<[1], [0], [0], [1], [0, 0, 1, 1], [], []>} : vector<8x128xbf16>, vector<128x128xbf16>, vector<8x128xf32> -> vector<8x128xf32>
    %4 = vector.broadcast %2 : vector<1x128xf32> to vector<8x128xf32>
    %5 = arith.addf %3, %4 : vector<8x128xf32>
    %cst_5 = arith.constant 0.000000e+00 : f32
    %6 = vector.broadcast %cst_5 : f32 to vector<8x128xf32>
    %7 = arith.maximumf %5, %6 : vector<8x128xf32>
    %c0_6 = arith.constant 0 : index
    %c0_7 = arith.constant 0 : index
    %8 = vector.load %arg3[%c0_6, %c0_7] : memref<128x128xbf16, #tpu.memory_space<vmem>>, vector<128x128xbf16>
    %c1 = arith.constant 1 : index
    %c0_8 = arith.constant 0 : index
    %9 = vector.load %arg5[%c1, %c0_8] : memref<3x128xf32, #tpu.memory_space<vmem>>, vector<1x128xf32>
    %10 = arith.truncf %7 : vector<8x128xf32> to vector<8x128xbf16>
    %cst_9 = arith.constant dense<0.000000e+00> : vector<8x128xf32>
    %11 = tpu.matmul %10, %8, %cst_9 {dimension_numbers = #tpu.dot_dimension_numbers<[1], [0], [0], [1], [0, 0, 1, 1], [], []>} : vector<8x128xbf16>, vector<128x128xbf16>, vector<8x128xf32> -> vector<8x128xf32>
    %12 = vector.broadcast %9 : vector<1x128xf32> to vector<8x128xf32>
    %13 = arith.addf %11, %12 : vector<8x128xf32>
    %cst_10 = arith.constant 0.000000e+00 : f32
    %14 = vector.broadcast %cst_10 : f32 to vector<8x128xf32>
    %15 = arith.maximumf %13, %14 : vector<8x128xf32>
    %c0_11 = arith.constant 0 : index
    %c0_12 = arith.constant 0 : index
    %16 = vector.load %arg4[%c0_11, %c0_12] : memref<128x128xbf16, #tpu.memory_space<vmem>>, vector<128x128xbf16>
    %c2 = arith.constant 2 : index
    %c0_13 = arith.constant 0 : index
    %17 = vector.load %arg5[%c2, %c0_13] : memref<3x128xf32, #tpu.memory_space<vmem>>, vector<1x128xf32>
    %18 = arith.truncf %15 : vector<8x128xf32> to vector<8x128xbf16>
    %cst_14 = arith.constant dense<0.000000e+00> : vector<8x128xf32>
    %19 = tpu.matmul %18, %16, %cst_14 {dimension_numbers = #tpu.dot_dimension_numbers<[1], [0], [0], [1], [0, 0, 1, 1], [], []>} : vector<8x128xbf16>, vector<128x128xbf16>, vector<8x128xf32> -> vector<8x128xf32>
    %20 = vector.broadcast %17 : vector<1x128xf32> to vector<8x128xf32>
    %21 = arith.addf %19, %20 : vector<8x128xf32>
    %22 = tpu.transpose %21, [1, 0] : vector<8x128xf32> -> vector<128x8xf32>
    %23 = vector.extract_strided_slice %22 {offsets = [0, 0], sizes = [8, 8], strides = [1, 1]} : vector<128x8xf32> to vector<8x8xf32>
    %c0_15 = arith.constant 0 : index
    %c0_16 = arith.constant 0 : index
    %24 = vector.load %arg6[%c0_15, %c0_16] : memref<8x8xf32, #tpu.memory_space<vmem>>, vector<8x8xf32>
    tpu.vector_store %arg6[%c0_15, %c0_16], %23 {strides = array<i32>} : memref<8x8xf32, #tpu.memory_space<vmem>>, vector<8x8xf32>,
    return
  }
  func.func @transform_0(%arg0: i32) -> (i32, i32) {
    %c0_i32 = arith.constant 0 : i32
    %c0_i32_0 = arith.constant 0 : i32
    return %arg0, %c0_i32 : i32, i32
  }
  func.func @transform_1(%arg0: i32) -> (i32, i32) {
    %c0_i32 = arith.constant 0 : i32
    %c0_i32_0 = arith.constant 0 : i32
    %c0_i32_1 = arith.constant 0 : i32
    return %c0_i32, %c0_i32_0 : i32, i32
  }
  func.func @transform_2(%arg0: i32) -> (i32, i32) {
    %c0_i32 = arith.constant 0 : i32
    %c0_i32_0 = arith.constant 0 : i32
    %c0_i32_1 = arith.constant 0 : i32
    return %c0_i32, %c0_i32_0 : i32, i32
  }
  func.func @transform_3(%arg0: i32) -> (i32, i32) {
    %c0_i32 = arith.constant 0 : i32
    %c0_i32_0 = arith.constant 0 : i32
    %c0_i32_1 = arith.constant 0 : i32
    return %c0_i32, %c0_i32_0 : i32, i32
  }
  func.func @transform_4(%arg0: i32) -> (i32, i32) {
    %c0_i32 = arith.constant 0 : i32
    %c0_i32_0 = arith.constant 0 : i32
    %c0_i32_1 = arith.constant 0 : i32
    return %c0_i32, %c0_i32_0 : i32, i32
  }
  func.func @transform_5(%arg0: i32) -> (i32, i32) {
    %c0_i32 = arith.constant 0 : i32
    %c0_i32_0 = arith.constant 0 : i32
    return %c0_i32, %arg0 : i32, i32
  }
}

</mosaic_0001>

<bundles_post_ra>
// kernel: _critic_pallas.1
= control target key start
LH: loop header
LB: loop body
LE: loop exit
PB: predicated region body
PF: predicated region fallthrough
CT: control target
= control target key end

     0   :  { %10 = vsyncpa [#allocation3], 0  ;;  %s870_s0 = inlined_call_operand.hbm [shape: bf16[8,128], index: 0, kind: input, shape index: {}]   ;;  %s871_s1 = inlined_call_operand.hbm [shape: bf16[128,128], index: 1, kind: input, shape index: {}]   ;;  %s872_s2 = inlined_call_operand.hbm [shape: bf16[128,128], index: 2, kind: input, shape index: {}]   ;;  %s873_s3 = inlined_call_operand.hbm [shape: bf16[128,128], index: 3, kind: input, shape index: {}]   ;;  %s874_s4 = inlined_call_operand.vmem [shape: f32[3,128], index: 4, kind: input, shape index: {}]   ;;  %s875_s5 = inlined_call_operand.hbm [shape: f32[8,8], index: 5, kind: output, shape index: {}]  }
   0x1   :  { %11 = vsyncpa [#allocation6], 0 }
   0x2   :  { %12 = vsyncpa [#allocation9], 0 }
   0x3   :  { %13 = vsyncpa [#allocation4], 0  ;;  %s723_s18 = smov [#allocation5]   ;;  %s605_s22 = scalar_lea.hbm %s871_s1, 1024 }
   0x4   :  { %s29_s19 = sshll.u32 %s723_s18, 4  ;;  %p606_p0 = scmp.ne.s32.totalorder %s871_s1, %s605_s22  ;;  %s30_s19 = int_to_ptr.vmem [resolvable:$true] %s29_s19 }
   0x5   :  { %p609_p1 = scmp.lt.u32.totalorder %s605_s22, %s871_s1 }
   0x7   :  { %p611_p2 = pnand %p609_p1, %p606_p0 }
   0x9   :  { %614 = shalt.err (!%p611_p2)
}
   0xa   :  { %s615_s27 = scalar_lea.vmem %s30_s19, 1024  ;;  %p620_p4 = scmp.lt.s32.totalorder %s30_s19, %s30_s19 }
   0xb   :  { %p616_p3 = scmp.ne.s32.totalorder %s30_s19, %s615_s27  ;;  %p621_p5 = scmp.lt.s32.totalorder %s615_s27, %s615_s27 }
   0xd   :  { %p622_p6 = por %p621_p5, %p620_p4 }
   0xf   :  { %p623_p7 = pnand %p622_p6, %p616_p3 }
  0x11   :  { %626 = shalt.err (!%p623_p7)
}
  0x12   :  { %s724_s28 = smov 64   ;;  %s725_s29 = smov 4  }
  0x13   :  { %35 = dma.hbm_to_vmem [thread:$0]  %s871_s1, 1024, %s30_s19, [#allocation6], %s724_s28, %s724_s28, %s725_s29  }
  0x14   :  { %s726_s7 = smov [#allocation2]   ;;  %s727_s9 = smov [#allocation7]  }
  0x15   :  { %s20_s8 = sshll.u32 %s726_s7, 4  ;;  %s41_s10 = sshll.u32 %s727_s9, 4  ;;  %s21_s8 = int_to_ptr.vmem [resolvable:$true] %s20_s8  ;;  %s42_s10 = int_to_ptr.vmem [resolvable:$true] %s41_s10 }
  0x16   :  { %s627_s13 = scalar_lea.hbm %s870_s0, 64 }
  0x17   :  { %p628_p8 = scmp.ne.s32.totalorder %s870_s0, %s627_s13  ;;  %p631_p9 = scmp.lt.u32.totalorder %s627_s13, %s870_s0 }
  0x19   :  { %p633_p10 = pnand %p631_p9, %p628_p8 }
  0x1b   :  { %636 = shalt.err (!%p633_p10)
}
  0x1c   :  { %s637_s1 = scalar_lea.vmem %s21_s8, 64  ;;  %p642_p12 = scmp.lt.s32.totalorder %s21_s8, %s21_s8 }
  0x1d   :  { %p638_p11 = scmp.ne.s32.totalorder %s21_s8, %s637_s1  ;;  %p643_p13 = scmp.lt.s32.totalorder %s637_s1, %s637_s1 }
  0x1f   :  { %p644_p0 = por %p643_p13, %p642_p12 }
  0x21   :  { %p645_p1 = pnand %p644_p0, %p638_p11 }
  0x23   :  { %648 = shalt.err (!%p645_p1)
}
  0x24   :  { %23 = dma.hbm_to_vmem [thread:$0]  %s870_s0, 64, %s21_s8, [#allocation3]  }
  0x25   :  { %s649_s22 = scalar_lea.hbm %s872_s2, 1024 }
  0x26   :  { %p650_p2 = scmp.ne.s32.totalorder %s872_s2, %s649_s22  ;;  %p653_p3 = scmp.lt.u32.totalorder %s649_s22, %s872_s2 }
  0x28   :  { %p655_p4 = pnand %p653_p3, %p650_p2 }
  0x2a   :  { %658 = shalt.err (!%p655_p4)
}
  0x2b   :  { %s659_s27 = scalar_lea.vmem %s42_s10, 1024  ;;  %p664_p6 = scmp.lt.s32.totalorder %s42_s10, %s42_s10 }
  0x2c   :  { %p660_p5 = scmp.ne.s32.totalorder %s42_s10, %s659_s27  ;;  %p665_p7 = scmp.lt.s32.totalorder %s659_s27, %s659_s27 }
  0x2e   :  { %p666_p8 = por %p665_p7, %p664_p6 }
  0x30   :  { %p667_p9 = pnand %p666_p8, %p660_p5 }
  0x32   :  { %670 = shalt.err (!%p667_p9)
}
  0x33   :  { %47 = dma.hbm_to_vmem [thread:$0]  %s872_s2, 1024, %s42_s10, [#allocation6], %s724_s28, %s724_s28, %s725_s29  }
  0x34   :  { %s728_s6 = smov [#allocation8]   ;;  %s671_s11 = scalar_lea.hbm %s873_s3, 1024 }
  0x35   :  { %s53_s7 = sshll.u32 %s728_s6, 4  ;;  %p672_p10 = scmp.ne.s32.totalorder %s873_s3, %s671_s11  ;;  %s54_s7 = int_to_ptr.vmem [resolvable:$true] %s53_s7 }
  0x36   :  { %p675_p11 = scmp.lt.u32.totalorder %s671_s11, %s873_s3 }
  0x38   :  { %p677_p12 = pnand %p675_p11, %p672_p10 }
  0x3a   :  { %680 = shalt.err (!%p677_p12)
}
  0x3b   :  { %s681_s16 = scalar_lea.vmem %s54_s7, 1024  ;;  %p686_p0 = scmp.lt.s32.totalorder %s54_s7, %s54_s7 }
  0x3c   :  { %p682_p13 = scmp.ne.s32.totalorder %s54_s7, %s681_s16  ;;  %p687_p1 = scmp.lt.s32.totalorder %s681_s16, %s681_s16 }
  0x3e   :  { %p688_p2 = por %p687_p1, %p686_p0 }
  0x40   :  { %p689_p3 = pnand %p688_p2, %p682_p13 }
  0x42   :  { %692 = shalt.err (!%p689_p3)
}
  0x43   :  { %59 = dma.hbm_to_vmem [thread:$0]  %s873_s3, 1024, %s54_s7, [#allocation9], %s724_s28, %s724_s28, %s725_s29  }
  0x44   :  { %715 = dma.done.wait [#allocation3], 64  }
  0x45   :  { %716 = vsyncadd [#allocation3], 4294967232 }
  0x46   :  { %717 = dma.done.wait [#allocation6], 2048  }
  0x47   :  { %718 = vsyncadd [#allocation6], 4294965248 }
  0x48   :  { %719 = dma.done.wait [#allocation9], 1024  }
  0x49   :  { %720 = vsyncadd [#allocation9], 4294966272  ;;  %v729_v0 = vmov 0.0   ;;  %vm730_vm0 = vmmov 0   ;;  %v581_v1 = vld [vmem:[#allocation5] sm:$0xff]   ;;  %v582_v2 = vld [vmem:[#allocation5 + $0x8] sm:$0xff]  }
  0x4a   :  { %512 = vmatprep.subr.bf16.mxu0 %v729_v0  ;;  %528 = vmatprep.mubr.msk.bf16.mxu0 %vm730_vm0, %v729_v0  ;;  %v583_v3 = vld [vmem:[#allocation5 + $0x10] sm:$0xff]   ;;  %v589_v4 = vld [vmem:[#allocation7] sm:$0xff]   ;;  %v584_v5 = vld [vmem:[#allocation5 + $0x18] sm:$0xff]   ;;  %s731_s19 = smov [#allocation10]   ;;  %vm439_vm1 = vcmask 64512  }
  0x4b   :  { %532 = vmatprep.subr.bf16.mxu1 %v729_v0  ;;  %548 = vmatprep.mubr.msk.bf16.mxu1 %vm730_vm0, %v729_v0  ;;  %v590_v6 = vld [vmem:[#allocation7 + $0x8] sm:$0xff]   ;;  %v585_v7 = vld [vmem:[#allocation5 + $0x20] sm:$0xff]   ;;  %v591_v8 = vld [vmem:[#allocation7 + $0x10] sm:$0xff]   ;;  %s447_s20 = sshll.u32 %s731_s19, 4  ;;  %s448_s20 = int_to_ptr.vmem [resolvable:$true] %s447_s20 }
  0x4c   :  { %513 = vmatpush3.bf16.msra.mxu0 %v581_v1  ;;  %533 = vmatpush3.bf16.msra.mxu1 %v589_v4  ;;  %v586_v9 = vld [vmem:[#allocation5 + $0x28] sm:$0xff]   ;;  %v592_v10 = vld [vmem:[#allocation7 + $0x18] sm:$0xff]   ;;  %v587_v11 = vld [vmem:[#allocation5 + $0x30] sm:$0xff]   ;;  %s693_s21 = scalar_lea.vmem %s448_s20, 128  ;;  %p698_p5 = scmp.lt.s32.totalorder %s448_s20, %s448_s20 }
  0x4d   :  { %514 = vmatprep.subr.bf16.mxu0 %v729_v0  ;;  %534 = vmatprep.subr.bf16.mxu1 %v729_v0  ;;  %v593_v12 = vld [vmem:[#allocation7 + $0x20] sm:$0xff]   ;;  %v588_v13 = vld [vmem:[#allocation5 + $0x38] sm:$0xff]   ;;  %v594_v14 = vld [vmem:[#allocation7 + $0x28] sm:$0xff]   ;;  %p694_p4 = scmp.ne.s32.totalorder %s448_s20, %s693_s21  ;;  %p699_p6 = scmp.lt.s32.totalorder %s693_s21, %s693_s21 }
  0x4e   :  { %v75_v15 = vld [vmem:[#allocation2] sm:$0xf]  ;;  %v595_v16 = vld [vmem:[#allocation7 + $0x30] sm:$0xff]   ;;  %v597_v18 = vld [vmem:[#allocation8] sm:$0xff]  }
  0x4f   :  { %v596_v17 = vld [vmem:[#allocation7 + $0x38] sm:$0xff]   ;;  %v598_v19 = vld [vmem:[#allocation8 + $0x8] sm:$0xff]   ;;  %v599_v20 = vld [vmem:[#allocation8 + $0x10] sm:$0xff]   ;;  %p700_p7 = por %p699_p6, %p698_p5 }
  0x50   :  { %515 = vmatpush3.bf16.msra.mxu0 %v582_v2  ;;  %535 = vmatpush3.bf16.msra.mxu1 %v590_v6  ;;  %v600_v21 = vld [vmem:[#allocation8 + $0x18] sm:$0xff]   ;;  %v601_v22 = vld [vmem:[#allocation8 + $0x20] sm:$0xff]   ;;  %v602_v23 = vld [vmem:[#allocation8 + $0x28] sm:$0xff]  }
  0x51   :  { %516 = vmatprep.subr.bf16.mxu0 %v729_v0  ;;  %536 = vmatprep.subr.bf16.mxu1 %v729_v0  ;;  %v458_v24 = vld [vmem:[%s874_s4] ss:$0 sm:$0xff]  ;;  %v603_v32 = vld [vmem:[#allocation8 + $0x30] sm:$0xff]   ;;  %v467_v34 = vld [vmem:[%s874_s4 + $0x1] ss:$0 sm:$0xff]  ;;  %p701_p8 = pnand %p700_p7, %p694_p4 }
  0x52   :  { %v604_v33 = vld [vmem:[#allocation8 + $0x38] sm:$0xff]  }
  0x53   :  { %v476_v42 = vld [vmem:[%s874_s4 + $0x2] ss:$0 sm:$0xff] }
  0x54   :  { %517 = vmatpush3.bf16.msra.mxu0 %v583_v3  ;;  %537 = vmatpush3.bf16.msra.mxu1 %v591_v8 }
  0x55   :  { %518 = vmatprep.subr.bf16.mxu0 %v729_v0  ;;  %538 = vmatprep.subr.bf16.mxu1 %v729_v0 }
  0x58   :  { %519 = vmatpush3.bf16.msra.mxu0 %v584_v5  ;;  %539 = vmatpush3.bf16.msra.mxu1 %v592_v10 }
  0x59   :  { %520 = vmatprep.subr.bf16.mxu0 %v729_v0  ;;  %540 = vmatprep.subr.bf16.mxu1 %v729_v0 }
  0x5c   :  { %521 = vmatpush3.bf16.msra.mxu0 %v585_v7  ;;  %541 = vmatpush3.bf16.msra.mxu1 %v593_v12 }
  0x5d   :  { %522 = vmatprep.subr.bf16.mxu0 %v729_v0  ;;  %542 = vmatprep.subr.bf16.mxu1 %v729_v0 }
  0x60   :  { %523 = vmatpush3.bf16.msra.mxu0 %v586_v9  ;;  %543 = vmatpush3.bf16.msra.mxu1 %v594_v14 }
  0x61   :  { %524 = vmatprep.subr.bf16.mxu0 %v729_v0  ;;  %544 = vmatprep.subr.bf16.mxu1 %v729_v0 }
  0x64   :  { %525 = vmatpush3.bf16.msra.mxu0 %v587_v11  ;;  %545 = vmatpush3.bf16.msra.mxu1 %v595_v16 }
  0x65   :  { %526 = vmatprep.subr.bf16.mxu0 %v729_v0  ;;  %546 = vmatprep.subr.bf16.mxu1 %v729_v0 }
  0x68   :  { %527 = vmatpush3.bf16.msra.mxu0 %v588_v13  ;;  %547 = vmatpush3.bf16.msra.mxu1 %v596_v17 }
  0x69   :  { %552 = vmatprep.subr.bf16.mxu0 %v729_v0 }
  0x6b   :  { %529 = vmatmul.mubr.bf16.vlgmr.msra.gmra.mrb[0].mxu0 %v75_v15 }
  0x6c   :  { %568 = vmatprep.mubr.msk.bf16.mxu0 %vm730_vm0, %v729_v0  ;;  %553 = vmatpush3.bf16.msra.mxu0 %v597_v18 }
  0x6d   :  { %554 = vmatprep.subr.bf16.mxu0 %v729_v0 }
  0x70   :  { %555 = vmatpush3.bf16.msra.mxu0 %v598_v19 }
  0x71   :  { %556 = vmatprep.subr.bf16.mxu0 %v729_v0 }
  0x74   :  { %557 = vmatpush3.bf16.msra.mxu0 %v599_v20 }
  0x75   :  { %558 = vmatprep.subr.bf16.mxu0 %v729_v0 }
  0x78   :  { %559 = vmatpush3.bf16.msra.mxu0 %v600_v21 }
  0x79   :  { %560 = vmatprep.subr.bf16.mxu0 %v729_v0 }
  0x7c   :  { %561 = vmatpush3.bf16.msra.mxu0 %v601_v22 }
  0x7d   :  { %562 = vmatprep.subr.bf16.mxu0 %v729_v0 }
  0x80   :  { %563 = vmatpush3.bf16.msra.mxu0 %v602_v23 }
  0x81   :  { %564 = vmatprep.subr.bf16.mxu0 %v729_v0 }
  0x84   :  { %565 = vmatpush3.bf16.msra.mxu0 %v603_v32 }
  0x85   :  { %566 = vmatprep.subr.bf16.mxu0 %v729_v0 }
  0x88   :  { %567 = vmatpush3.bf16.msra.mxu0 %v604_v33 }
 0x13e   :  { %v179_v25 = vpop.f32.mrb[0].mxu0 }
 0x13f   :  { %v180_v26 = vadd.f32 %v458_v24, %v179_v25  ;;  %v530_v27 = vpop.f32.mrb[1].mxu0 }
 0x140   :  { %v182_v28 = vpop.f32.mrb[2].mxu0 }
 0x141   :  { %v185_v29 = vmax.f32 %v180_v26, 0.0  ;;  %v531_v30 = vpop.f32.mrb[3].mxu0 }
 0x143   :  { %v203_v31 = vpack.c.bf16 %v185_v29, %v185_v29 }
 0x145   :  { %549 = vmatmul.mubr.bf16.vlgmr.msra.gmra.mrb[0].mxu1 %v203_v31 }
 0x218   :  { %v290_v35 = vpop.f32.mrb[0].mxu1 }
 0x219   :  { %v291_v36 = vadd.f32 %v467_v34, %v290_v35  ;;  %v550_v37 = vpop.f32.mrb[1].mxu1 }
 0x21a   :  { %v293_v38 = vpop.f32.mrb[2].mxu1 }
 0x21b   :  { %v296_v39 = vmax.f32 %v291_v36, 0.0  ;;  %v551_v40 = vpop.f32.mrb[3].mxu1 }
 0x21d   :  { %v314_v41 = vpack.c.bf16 %v296_v39, %v296_v39 }
 0x21f   :  { %569 = vmatmul.mubr.bf16.vlgmr.msra.gmra.mrb[4].mxu0 %v314_v41 }
 0x2f2   :  { %v401_v43 = vpop.f32.mrb[4].mxu0 }
 0x2f3   :  { %v570_v44 = vpop.f32.mrb[5].mxu0  ;;  %v402_v45 = vadd.f32 %v476_v42, %v401_v43 }
 0x2f4   :  { %v404_v46 = vpop.f32.mrb[6].mxu0 }
 0x2f5   :  { %407 = vxpose.xlu0.b32.start.end [1/1] (short) (narrow) %v402_v45, 8  ;;  %v571_v47 = vpop.f32.mrb[7].mxu0 }
 0x375   :  { %v423_v48 = vpop.trf.xlu0 }
 0x376   :  { %440 = vst.msk [vmem:[#allocation10] sm:$0xff] %vm439_vm1, %v423_v48 }
 0x377   :  { %704 = shalt.err (!%p701_p8)
}
 0x378   :  { %s705_s23 = scalar_lea.hbm %s875_s5, 128 }
 0x379   :  { %p706_p9 = scmp.ne.s32.totalorder %s875_s5, %s705_s23  ;;  %p709_p10 = scmp.lt.u32.totalorder %s705_s23, %s875_s5 }
 0x37b   :  { %p711_p11 = pnand %p709_p10, %p706_p9 }
 0x37d   :  { %714 = shalt.err (!%p711_p11)
}
 0x37e   :  { %450 = dma.vmem_to_hbm [thread:$0]  %s448_s20, 128, %s875_s5, [#allocation4]  }
 0x37f   :  { %721 = dma.done.wait [#allocation4], 128  }
 0x380   :  { %722 = vsyncadd [#allocation4], 4294967168 }
 0x381   :  { %454 = vsyncpa [#allocation3], 1 }
 0x382   :  { %455 = vsyncpa [#allocation6], 1 }
 0x383   :  { %456 = vsyncpa [#allocation9], 1 }
 0x384   :  { %457 = vsyncpa [#allocation4], 1 }

// kernel: _critic_pallas.1
= control target key start
LH: loop header
LB: loop body
LE: loop exit
PB: predicated region body
PF: predicated region fallthrough
CT: control target
= control target key end

     0   :  { %10 = vsyncpa [#allocation3], 0  ;;  %s870_s0 = inlined_call_operand.hbm [shape: bf16[8,128], index: 0, kind: input, shape index: {}]   ;;  %s871_s1 = inlined_call_operand.hbm [shape: bf16[128,128], index: 1, kind: input, shape index: {}]   ;;  %s872_s2 = inlined_call_operand.hbm [shape: bf16[128,128], index: 2, kind: input, shape index: {}]   ;;  %s873_s3 = inlined_call_operand.hbm [shape: bf16[128,128], index: 3, kind: input, shape index: {}]   ;;  %s874_s4 = inlined_call_operand.vmem [shape: f32[3,128], index: 4, kind: input, shape index: {}]   ;;  %s875_s5 = inlined_call_operand.hbm [shape: f32[8,8], index: 5, kind: output, shape index: {}]  }
   0x1   :  { %11 = vsyncpa [#allocation6], 0 }
   0x2   :  { %12 = vsyncpa [#allocation9], 0 }
   0x3   :  { %13 = vsyncpa [#allocation4], 0  ;;  %s723_s18 = smov [#allocation5]   ;;  %s605_s22 = scalar_lea.hbm %s871_s1, 1024 }
   0x4   :  { %s29_s19 = sshll.u32 %s723_s18, 4  ;;  %p606_p0 = scmp.ne.s32.totalorder %s871_s1, %s605_s22  ;;  %s30_s19 = int_to_ptr.vmem [resolvable:$true] %s29_s19 }
   0x5   :  { %p609_p1 = scmp.lt.u32.totalorder %s605_s22, %s871_s1 }
   0x7   :  { %p611_p2 = pnand %p609_p1, %p606_p0 }
   0x9   :  { %614 = shalt.err (!%p611_p2)
}
   0xa   :  { %s615_s27 = scalar_lea.vmem %s30_s19, 1024  ;;  %p620_p4 = scmp.lt.s32.totalorder %s30_s19, %s30_s19 }
   0xb   :  { %p616_p3 = scmp.ne.s32.totalorder %s30_s19, %s615_s27  ;;  %p621_p5 = scmp.lt.s32.totalorder %s615_s27, %s615_s27 }
   0xd   :  { %p622_p6 = por %p621_p5, %p620_p4 }
   0xf   :  { %p623_p7 = pnand %p622_p6, %p616_p3 }
  0x11   :  { %626 = shalt.err (!%p623_p7)
}
  0x12   :  { %s724_s28 = smov 64   ;;  %s725_s29 = smov 4  }
  0x13   :  { %35 = dma.hbm_to_vmem [thread:$0]  %s871_s1, 1024, %s30_s19, [#allocation6], %s724_s28, %s724_s28, %s725_s29  }
  0x14   :  { %s726_s7 = smov [#allocation2]   ;;  %s727_s9 = smov [#allocation7]  }
  0x15   :  { %s20_s8 = sshll.u32 %s726_s7, 4  ;;  %s41_s10 = sshll.u32 %s727_s9, 4  ;;  %s21_s8 = int_to_ptr.vmem [resolvable:$true] %s20_s8  ;;  %s42_s10 = int_to_ptr.vmem [resolvable:$true] %s41_s10 }
  0x16   :  { %s627_s13 = scalar_lea.hbm %s870_s0, 64 }
  0x17   :  { %p628_p8 = scmp.ne.s32.totalorder %s870_s0, %s627_s13  ;;  %p631_p9 = scmp.lt.u32.totalorder %s627_s13, %s870_s0 }
  0x19   :  { %p633_p10 = pnand %p631_p9, %p628_p8 }
  0x1b   :  { %636 = shalt.err (!%p633_p10)
}
  0x1c   :  { %s637_s1 = scalar_lea.vmem %s21_s8, 64  ;;  %p642_p12 = scmp.lt.s32.totalorder %s21_s8, %s21_s8 }
  0x1d   :  { %p638_p11 = scmp.ne.s32.totalorder %s21_s8, %s637_s1  ;;  %p643_p13 = scmp.lt.s32.totalorder %s637_s1, %s637_s1 }
  0x1f   :  { %p644_p0 = por %p643_p13, %p642_p12 }
  0x21   :  { %p645_p1 = pnand %p644_p0, %p638_p11 }
  0x23   :  { %648 = shalt.err (!%p645_p1)
}
  0x24   :  { %23 = dma.hbm_to_vmem [thread:$0]  %s870_s0, 64, %s21_s8, [#allocation3]  }
  0x25   :  { %s649_s22 = scalar_lea.hbm %s872_s2, 1024 }
  0x26   :  { %p650_p2 = scmp.ne.s32.totalorder %s872_s2, %s649_s22  ;;  %p653_p3 = scmp.lt.u32.totalorder %s649_s22, %s872_s2 }
  0x28   :  { %p655_p4 = pnand %p653_p3, %p650_p2 }
  0x2a   :  { %658 = shalt.err (!%p655_p4)
}
  0x2b   :  { %s659_s27 = scalar_lea.vmem %s42_s10, 1024  ;;  %p664_p6 = scmp.lt.s32.totalorder %s42_s10, %s42_s10 }
  0x2c   :  { %p660_p5 = scmp.ne.s32.totalorder %s42_s10, %s659_s27  ;;  %p665_p7 = scmp.lt.s32.totalorder %s659_s27, %s659_s27 }
  0x2e   :  { %p666_p8 = por %p665_p7, %p664_p6 }
  0x30   :  { %p667_p9 = pnand %p666_p8, %p660_p5 }
  0x32   :  { %670 = shalt.err (!%p667_p9)
}
  0x33   :  { %47 = dma.hbm_to_vmem [thread:$0]  %s872_s2, 1024, %s42_s10, [#allocation6], %s724_s28, %s724_s28, %s725_s29  }
  0x34   :  { %s728_s6 = smov [#allocation8]   ;;  %s671_s11 = scalar_lea.hbm %s873_s3, 1024 }
  0x35   :  { %s53_s7 = sshll.u32 %s728_s6, 4  ;;  %p672_p10 = scmp.ne.s32.totalorder %s873_s3, %s671_s11  ;;  %s54_s7 = int_to_ptr.vmem [resolvable:$true] %s53_s7 }
  0x36   :  { %p675_p11 = scmp.lt.u32.totalorder %s671_s11, %s873_s3 }
  0x38   :  { %p677_p12 = pnand %p675_p11, %p672_p10 }
  0x3a   :  { %680 = shalt.err (!%p677_p12)
}
  0x3b   :  { %s681_s16 = scalar_lea.vmem %s54_s7, 1024  ;;  %p686_p0 = scmp.lt.s32.totalorder %s54_s7, %s54_s7 }
  0x3c   :  { %p682_p13 = scmp.ne.s32.totalorder %s54_s7, %s681_s16  ;;  %p687_p1 = scmp.lt.s32.totalorder %s681_s16, %s681_s16 }
  0x3e   :  { %p688_p2 = por %p687_p1, %p686_p0 }
  0x40   :  { %p689_p3 = pnand %p688_p2, %p682_p13 }
  0x42   :  { %692 = shalt.err (!%p689_p3)
}
  0x43   :  { %59 = dma.hbm_to_vmem [thread:$0]  %s873_s3, 1024, %s54_s7, [#allocation9], %s724_s28, %s724_s28, %s725_s29  }
  0x44   :  { %715 = dma.done.wait [#allocation3], 64  }
  0x45   :  { %716 = vsyncadd [#allocation3], 4294967232 }
  0x46   :  { %717 = dma.done.wait [#allocation6], 2048  }
  0x47   :  { %718 = vsyncadd [#allocation6], 4294965248 }
  0x48   :  { %719 = dma.done.wait [#allocation9], 1024  }
  0x49   :  { %720 = vsyncadd [#allocation9], 4294966272  ;;  %v729_v0 = vmov 0.0   ;;  %vm730_vm0 = vmmov 0   ;;  %v581_v1 = vld [vmem:[#allocation5] sm:$0xff]   ;;  %v582_v2 = vld [vmem:[#allocation5 + $0x8] sm:$0xff]  }
  0x4a   :  { %512 = vmatprep.subr.bf16.mxu0 %v729_v0  ;;  %528 = vmatprep.mubr.msk.bf16.mxu0 %vm730_vm0, %v729_v0  ;;  %v583_v3 = vld [vmem:[#allocation5 + $0x10] sm:$0xff]   ;;  %v589_v4 = vld [vmem:[#allocation7] sm:$0xff]   ;;  %v584_v5 = vld [vmem:[#allocation5 + $0x18] sm:$0xff]   ;;  %s731_s19 = smov [#allocation10]   ;;  %vm439_vm1 = vcmask 64512  }
  0x4b   :  { %532 = vmatprep.subr.bf16.mxu1 %v729_v0  ;;  %548 = vmatprep.mubr.msk.bf16.mxu1 %vm730_vm0, %v729_v0  ;;  %v590_v6 = vld [vmem:[#allocation7 + $0x8] sm:$0xff]   ;;  %v585_v7 = vld [vmem:[#allocation5 + $0x20] sm:$0xff]   ;;  %v591_v8 = vld [vmem:[#allocation7 + $0x10] sm:$0xff]   ;;  %s447_s20 = sshll.u32 %s731_s19, 4  ;;  %s448_s20 = int_to_ptr.vmem [resolvable:$true] %s447_s20 }
  0x4c   :  { %513 = vmatpush3.bf16.msra.mxu0 %v581_v1  ;;  %533 = vmatpush3.bf16.msra.mxu1 %v589_v4  ;;  %v586_v9 = vld [vmem:[#allocation5 + $0x28] sm:$0xff]   ;;  %v592_v10 = vld [vmem:[#allocation7 + $0x18] sm:$0xff]   ;;  %v587_v11 = vld [vmem:[#allocation5 + $0x30] sm:$0xff]   ;;  %s693_s21 = scalar_lea.vmem %s448_s20, 128  ;;  %p698_p5 = scmp.lt.s32.totalorder %s448_s20, %s448_s20 }
  0x4d   :  { %514 = vmatprep.subr.bf16.mxu0 %v729_v0  ;;  %534 = vmatprep.subr.bf16.mxu1 %v729_v0  ;;  %v593_v12 = vld [vmem:[#allocation7 + $0x20] sm:$0xff]   ;;  %v588_v13 = vld [vmem:[#allocation5 + $0x38] sm:$0xff]   ;;  %v594_v14 = vld [vmem:[#allocation7 + $0x28] sm:$0xff]   ;;  %p694_p4 = scmp.ne.s32.totalorder %s448_s20, %s693_s21  ;;  %p699_p6 = scmp.lt.s32.totalorder %s693_s21, %s693_s21 }
  0x4e   :  { %v75_v15 = vld [vmem:[#allocation2] sm:$0xf]  ;;  %v595_v16 = vld [vmem:[#allocation7 + $0x30] sm:$0xff]   ;;  %v597_v18 = vld [vmem:[#allocation8] sm:$0xff]  }
  0x4f   :  { %v596_v17 = vld [vmem:[#allocation7 + $0x38] sm:$0xff]   ;;  %v598_v19 = vld [vmem:[#allocation8 + $0x8] sm:$0xff]   ;;  %v599_v20 = vld [vmem:[#allocation8 + $0x10] sm:$0xff]   ;;  %p700_p7 = por %p699_p6, %p698_p5 }
  0x50   :  { %515 = vmatpush3.bf16.msra.mxu0 %v582_v2  ;;  %535 = vmatpush3.bf16.msra.mxu1 %v590_v6  ;;  %v600_v21 = vld [vmem:[#allocation8 + $0x18] sm:$0xff]   ;;  %v601_v22 = vld [vmem:[#allocation8 + $0x20] sm:$0xff]   ;;  %v602_v23 = vld [vmem:[#allocation8 + $0x28] sm:$0xff]  }
  0x51   :  { %516 = vmatprep.subr.bf16.mxu0 %v729_v0  ;;  %536 = vmatprep.subr.bf16.mxu1 %v729_v0  ;;  %v458_v24 = vld [vmem:[%s874_s4] ss:$0 sm:$0xff]  ;;  %v603_v32 = vld [vmem:[#allocation8 + $0x30] sm:$0xff]   ;;  %v467_v34 = vld [vmem:[%s874_s4 + $0x1] ss:$0 sm:$0xff]  ;;  %p701_p8 = pnand %p700_p7, %p694_p4 }
  0x52   :  { %v604_v33 = vld [vmem:[#allocation8 + $0x38] sm:$0xff]  }
  0x53   :  { %v476_v42 = vld [vmem:[%s874_s4 + $0x2] ss:$0 sm:$0xff] }
  0x54   :  { %517 = vmatpush3.bf16.msra.mxu0 %v583_v3  ;;  %537 = vmatpush3.bf16.msra.mxu1 %v591_v8 }
  0x55   :  { %518 = vmatprep.subr.bf16.mxu0 %v729_v0  ;;  %538 = vmatprep.subr.bf16.mxu1 %v729_v0 }
  0x58   :  { %519 = vmatpush3.bf16.msra.mxu0 %v584_v5  ;;  %539 = vmatpush3.bf16.msra.mxu1 %v592_v10 }
  0x59   :  { %520 = vmatprep.subr.bf16.mxu0 %v729_v0  ;;  %540 = vmatprep.subr.bf16.mxu1 %v729_v0 }
  0x5c   :  { %521 = vmatpush3.bf16.msra.mxu0 %v585_v7  ;;  %541 = vmatpush3.bf16.msra.mxu1 %v593_v12 }
  0x5d   :  { %522 = vmatprep.subr.bf16.mxu0 %v729_v0  ;;  %542 = vmatprep.subr.bf16.mxu1 %v729_v0 }
  0x60   :  { %523 = vmatpush3.bf16.msra.mxu0 %v586_v9  ;;  %543 = vmatpush3.bf16.msra.mxu1 %v594_v14 }
  0x61   :  { %524 = vmatprep.subr.bf16.mxu0 %v729_v0  ;;  %544 = vmatprep.subr.bf16.mxu1 %v729_v0 }
  0x64   :  { %525 = vmatpush3.bf16.msra.mxu0 %v587_v11  ;;  %545 = vmatpush3.bf16.msra.mxu1 %v595_v16 }
  0x65   :  { %526 = vmatprep.subr.bf16.mxu0 %v729_v0  ;;  %546 = vmatprep.subr.bf16.mxu1 %v729_v0 }
  0x68   :  { %527 = vmatpush3.bf16.msra.mxu0 %v588_v13  ;;  %547 = vmatpush3.bf16.msra.mxu1 %v596_v17 }
  0x69   :  { %552 = vmatprep.subr.bf16.mxu0 %v729_v0 }
  0x6b   :  { %529 = vmatmul.mubr.bf16.vlgmr.msra.gmra.mrb[0].mxu0 %v75_v15 }
  0x6c   :  { %568 = vmatprep.mubr.msk.bf16.mxu0 %vm730_vm0, %v729_v0  ;;  %553 = vmatpush3.bf16.msra.mxu0 %v597_v18 }
  0x6d   :  { %554 = vmatprep.subr.bf16.mxu0 %v729_v0 }
  0x70   :  { %555 = vmatpush3.bf16.msra.mxu0 %v598_v19 }
  0x71   :  { %556 = vmatprep.subr.bf16.mxu0 %v729_v0 }
  0x74   :  { %557 = vmatpush3.bf16.msra.mxu0 %v599_v20 }
  0x75   :  { %558 = vmatprep.subr.bf16.mxu0 %v729_v0 }
  0x78   :  { %559 = vmatpush3.bf16.msra.mxu0 %v600_v21 }
  0x79   :  { %560 = vmatprep.subr.bf16.mxu0 %v729_v0 }
  0x7c   :  { %561 = vmatpush3.bf16.msra.mxu0 %v601_v22 }
  0x7d   :  { %562 = vmatprep.subr.bf16.mxu0 %v729_v0 }
  0x80   :  { %563 = vmatpush3.bf16.msra.mxu0 %v602_v23 }
  0x81   :  { %564 = vmatprep.subr.bf16.mxu0 %v729_v0 }
  0x84   :  { %565 = vmatpush3.bf16.msra.mxu0 %v603_v32 }
  0x85   :  { %566 = vmatprep.subr.bf16.mxu0 %v729_v0 }
  0x88   :  { %567 = vmatpush3.bf16.msra.mxu0 %v604_v33 }
 0x13e   :  { %v179_v25 = vpop.f32.mrb[0].mxu0 }
 0x13f   :  { %v180_v26 = vadd.f32 %v458_v24, %v179_v25  ;;  %v530_v27 = vpop.f32.mrb[1].mxu0 }
 0x140   :  { %v182_v28 = vpop.f32.mrb[2].mxu0 }
 0x141   :  { %v185_v29 = vmax.f32 %v180_v26, 0.0  ;;  %v531_v30 = vpop.f32.mrb[3].mxu0 }
 0x143   :  { %v203_v31 = vpack.c.bf16 %v185_v29, %v185_v29 }
 0x145   :  { %549 = vmatmul.mubr.bf16.vlgmr.msra.gmra.mrb[0].mxu1 %v203_v31 }
 0x218   :  { %v290_v35 = vpop.f32.mrb[0].mxu1 }
 0x219   :  { %v291_v36 = vadd.f32 %v467_v34, %v290_v35  ;;  %v550_v37 = vpop.f32.mrb[1].mxu1 }
 0x21a   :  { %v293_v38 = vpop.f32.mrb[2].mxu1 }
 0x21b   :  { %v296_v39 = vmax.f32 %v291_v36, 0.0  ;;  %v551_v40 = vpop.f32.mrb[3].mxu1 }
 0x21d   :  { %v314_v41 = vpack.c.bf16 %v296_v39, %v296_v39 }
 0x21f   :  { %569 = vmatmul.mubr.bf16.vlgmr.msra.gmra.mrb[4].mxu0 %v314_v41 }
 0x2f2   :  { %v401_v43 = vpop.f32.mrb[4].mxu0 }
 0x2f3   :  { %v570_v44 = vpop.f32.mrb[5].mxu0  ;;  %v402_v45 = vadd.f32 %v476_v42, %v401_v43 }
 0x2f4   :  { %v404_v46 = vpop.f32.mrb[6].mxu0 }
 0x2f5   :  { %407 = vxpose.xlu0.b32.start.end [1/1] (short) (narrow) %v402_v45, 8  ;;  %v571_v47 = vpop.f32.mrb[7].mxu0 }
 0x375   :  { %v423_v48 = vpop.trf.xlu0 }
 0x376   :  { %440 = vst.msk [vmem:[#allocation10] sm:$0xff] %vm439_vm1, %v423_v48 }
 0x377   :  { %704 = shalt.err (!%p701_p8)
}
 0x378   :  { %s705_s23 = scalar_lea.hbm %s875_s5, 128 }
 0x379   :  { %p706_p9 = scmp.ne.s32.totalorder %s875_s5, %s705_s23  ;;  %p709_p10 = scmp.lt.u32.totalorder %s705_s23, %s875_s5 }
 0x37b   :  { %p711_p11 = pnand %p709_p10, %p706_p9 }
 0x37d   :  { %714 = shalt.err (!%p711_p11)
}
 0x37e   :  { %450 = dma.vmem_to_hbm [thread:$0]  %s448_s20, 128, %s875_s5, [#allocation4]  }
 0x37f   :  { %721 = dma.done.wait [#allocation4], 128  }
 0x380   :  { %722 = vsyncadd [#allocation4], 4294967168 }
 0x381   :  { %454 = vsyncpa [#allocation3], 1 }
 0x382   :  { %455 = vsyncpa [#allocation6], 1 }
 0x383   :  { %456 = vsyncpa [#allocation9], 1 }
 0x384   :  { %457 = vsyncpa [#allocation4], 1 }

</bundles_post_ra>
